<compile_context>
chip_gen: v7x
topology: tpu7x:2x2x1
jax: 0.10.0
libtpu: 0.0.40
codegen_flags: <defaults>
</compile_context>

<pallas_src>
import functools

import numpy as np

import jax
import jax.numpy as jnp
from jax.experimental import pallas as pl
from jax.experimental.pallas import tpu as pltpu


def _cross_attention_kernel(
    x_ref, c_ref, mask_ref,
    wq_ref, bq_ref, wk_ref, bk_ref, wv_ref, bv_ref, wo_ref, bo_ref,
    o_ref,
    *, n_heads: int,
):
    f32 = jnp.float32
    bf16 = jnp.bfloat16

    # ---- q/k/v projections: bf16 MXU operands, f32 accumulation, f32 bias ---
    xb = x_ref[...].astype(bf16)                      # (L,  in_dim)
    cb = c_ref[...].astype(bf16)                      # (Lc, d_cond)
    q = jnp.dot(xb, wq_ref[...], preferred_element_type=f32) + bq_ref[...]
    k = jnp.dot(cb, wk_ref[...], preferred_element_type=f32) + bk_ref[...]
    v = jnp.dot(cb, wv_ref[...], preferred_element_type=f32) + bv_ref[...]
    # (the reference's `q * scale` multiply is folded into wq at prep time)

    # ---- head-block-diagonal K / V -------------------------------------------
    # mask[h*Lc + j, c] = 1 iff feature column c belongs to head h.  Built once
    # on the host, DMA'd once (constant index_map) and resident in VMEM; per
    # step we only pay the masked-tile multiply (f32 VPU) + bf16 cast.
    mask_bf = mask_ref[...]                           # (H*Lc, attn_dim) bf16
    mask_f = mask_bf.astype(f32)
    k_bd = (jnp.tile(k, (n_heads, 1)) * mask_f).astype(bf16)   # (H*Lc, attn)
    v_bd = (jnp.tile(v, (n_heads, 1)) * mask_f).astype(bf16)   # (H*Lc, attn)

    # ---- scores for ALL heads in one MXU matmul ------------------------------
    # Contract the feature dim of both operands ("NT" matmul): no kb.T needed.
    s = jax.lax.dot_general(
        q.astype(bf16), k_bd,
        dimension_numbers=(((1,), (1,)), ((), ())),
        preferred_element_type=f32)                   # (L, H*Lc)

    # ---- per-head softmax (all elementwise math in f32) ----------------------
    # Subtracting the global per-row max is exact per segment (shift invariance
    # of softmax) and avoids a segmented lane reduction.
    s = s - jnp.max(s, axis=-1, keepdims=True)
    p = jnp.exp(s)                                    # (L, H*Lc) f32
    p_bf = p.astype(bf16)

    # Weighted sum lands directly in the interleaved (L, H*head_dim) layout the
    # output projection expects.  The denominator reuses the resident mask as
    # the RHS (fine at head_dim=4; for production head dims use a per-segment
    # ones matrix / per-head dot_general instead — see header note).
    num = jnp.dot(p_bf, v_bd, preferred_element_type=f32)      # (L, attn)
    den = jnp.dot(p_bf, mask_bf, preferred_element_type=f32)   # (L, attn)
    res = num * pl.reciprocal(den, approx=True)                # EUP slot

    # ---- output projection ----------------------------------------------------
    out = jnp.dot(res.astype(bf16), wo_ref[...],
                  preferred_element_type=f32) + bo_ref[...]
    o_ref[...] = out.astype(o_ref.dtype)


def _head_block_mask(n_heads: int, seq_kv: int, head_dim: int):
    """mask[h*seq_kv + j, c] = 1.0 iff c // head_dim == h (0/1 exact in bf16)."""
    row_head = np.arange(n_heads * seq_kv) // seq_kv
    col_head = np.arange(n_heads * head_dim) // head_dim
    return jnp.asarray(row_head[:, None] == col_head[None, :], dtype=jnp.bfloat16)


def prepare_params(params, *, n_heads: int):
    """One-time parameter transform: fold `scale` into wq and cast the matmul
    weights to bf16 (MXU-native on v5e/v6e/v7x; halves weight DMA + VMEM).
    Biases stay f32 (they are VPU adds, not MXU operands)."""
    attn_dim = params["wq"].shape[1]
    scale = (attn_dim / n_heads) ** 0.5
    return {
        "wq": (params["wq"] * scale).astype(jnp.bfloat16),
        "wk": params["wk"].astype(jnp.bfloat16),
        "wv": params["wv"].astype(jnp.bfloat16),
        "wo": params["wo"].astype(jnp.bfloat16),
        "bq": params["bq"].astype(jnp.float32),
        "bk": params["bk"].astype(jnp.float32),
        "bv": params["bv"].astype(jnp.float32),
        "bo": params["bo"].astype(jnp.float32),
    }


def cross_attention(x, cond, prepped, *, n_heads: int):
    """x: (B, L, in_dim); cond: (B, Lc, d_cond) or None (self-attention; only
    valid when d_cond == in_dim, exactly as in the PyTorch module).
    `prepped` must come from prepare_params (scale folded in, bf16 weights)."""
    if cond is None:
        cond = x

    B, L, in_dim = x.shape
    Bc, Lc, d_cond = cond.shape
    assert Bc == B
    attn_dim = prepped["wq"].shape[1]
    assert prepped["wq"].shape[0] == in_dim
    assert prepped["wk"].shape[0] == d_cond, (
        "cond feature dim must match the k/v projection input dim "
        "(for cond=None this requires d_cond == in_dim)")
    assert attn_dim % n_heads == 0
    head_dim = attn_dim // n_heads

    # Flatten batch into the row (M) dimension; the grid walks one batch
    # element per step.  For production L, add an L-tile grid axis as well.
    x2 = x.reshape(B * L, in_dim).astype(jnp.float32)
    c2 = cond.reshape(B * Lc, d_cond).astype(jnp.float32)
    mask = _head_block_mask(n_heads, Lc, head_dim)        # (H*Lc, attn) bf16

    kernel = functools.partial(_cross_attention_kernel, n_heads=n_heads)
    weight_keys = ("wq", "bq", "wk", "bk", "wv", "bv", "wo", "bo")
    const2d = lambda b: (0, 0)                            # resident across steps

    # --- explicit scoped-VMEM sizing from the real per-step footprint ---------
    def nbytes(shape, dtype):
        return int(np.prod(shape)) * jnp.dtype(dtype).itemsize

    step_bytes = (
        nbytes((L, in_dim), jnp.float32) * 2              # x tile + out tile
        + nbytes((Lc, d_cond), jnp.float32)               # cond tile
        + int(mask.nbytes)
        + sum(int(prepped[k].nbytes) for k in weight_keys)
        + nbytes((L, attn_dim), jnp.float32) * 4          # q / num / den / res
        + nbytes((Lc, attn_dim), jnp.float32) * 2         # k, v
        + nbytes((n_heads * Lc, attn_dim), jnp.bfloat16) * 2   # k_bd, v_bd
        + nbytes((L, n_heads * Lc), jnp.float32) * 2      # s, p
    )
    # headroom for double-buffered tiles + compiler temporaries
    vmem_limit = int(min(100 * 1024 * 1024, max(4 * 1024 * 1024, 4 * step_bytes)))

    # --- advisory cost estimate for the XLA scheduler --------------------------
    flops = 2 * B * (
        L * in_dim * attn_dim                  # q projection
        + 2 * Lc * d_cond * attn_dim           # k, v projections
        + L * attn_dim * (n_heads * Lc)        # scores (block-diagonal K)
        + 2 * L * (n_heads * Lc) * attn_dim    # weighted sum + denominator
        + L * attn_dim * in_dim)               # output projection
    transcendentals = B * (L * n_heads * Lc + L * attn_dim)
    bytes_accessed = int(
        x2.nbytes + c2.nbytes + int(mask.nbytes)
        + sum(int(prepped[k].nbytes) for k in weight_keys)
        + B * L * in_dim * 4)

    out2 = pl.pallas_call(
        kernel,
        out_shape=jax.ShapeDtypeStruct((B * L, in_dim), jnp.float32),
        grid=(B,),
        in_specs=[
            pl.BlockSpec((L, in_dim), lambda b: (b, 0)),      # x tile per step
            pl.BlockSpec((Lc, d_cond), lambda b: (b, 0)),     # cond tile per step
            pl.BlockSpec(mask.shape, const2d),                # resident mask
            pl.BlockSpec(prepped["wq"].shape, const2d),       # resident weights
            pl.BlockSpec(prepped["bq"].shape, const2d),
            pl.BlockSpec(prepped["wk"].shape, const2d),
            pl.BlockSpec(prepped["bk"].shape, const2d),
            pl.BlockSpec(prepped["wv"].shape, const2d),
            pl.BlockSpec(prepped["bv"].shape, const2d),
            pl.BlockSpec(prepped["wo"].shape, const2d),
            pl.BlockSpec(prepped["bo"].shape, const2d),
        ],
        out_specs=pl.BlockSpec((L, in_dim), lambda b: (b, 0)),
        compiler_params=pltpu.CompilerParams(
            dimension_semantics=("parallel",),                # megacore on v7x
            vmem_limit_bytes=vmem_limit),
        cost_estimate=pl.CostEstimate(
            flops=flops, transcendentals=transcendentals,
            bytes_accessed=bytes_accessed),
    )(x2, c2, mask,
      prepped["wq"], prepped["bq"], prepped["wk"], prepped["bk"],
      prepped["wv"], prepped["bv"], prepped["wo"], prepped["bo"])
    return out2.reshape(B, L, in_dim)


def cross_attention_ref(x, cond, params, *, n_heads: int):
    """Pure-JAX f32 reference mirroring the (intended) PyTorch forward."""
    if cond is None:
        cond = x
    attn_dim = params["wq"].shape[1]
    scale = (attn_dim / n_heads) ** 0.5
    q = x @ params["wq"] + params["bq"][0]
    k = cond @ params["wk"] + params["bk"][0]
    v = cond @ params["wv"] + params["bv"][0]
    B, L, _ = q.shape
    Lc = k.shape[1]
    hd = attn_dim // n_heads
    q = q.reshape(B, L, n_heads, hd).transpose(0, 2, 1, 3) * scale
    k = k.reshape(B, Lc, n_heads, hd).transpose(0, 2, 1, 3)
    v = v.reshape(B, Lc, n_heads, hd).transpose(0, 2, 1, 3)
    scores = jnp.einsum("bnih,bnjh->bnij", q, k)
    scores = jax.nn.softmax(scores, axis=-1)
    res = jnp.einsum("bnij,bnjh->bnih", scores, v)
    res = res.transpose(0, 2, 1, 3).reshape(B, L, attn_dim)
    return res @ params["wo"] + params["bo"][0]


def init_params(key, in_dim, d_cond, attn_dim):
    """Synthetic parameters. nn.Linear weights stored transposed as (in, out)
    so the kernel does x @ W + b."""
    ks = jax.random.split(key, 8)
    s = 0.05
    return {
        "wq": s * jax.random.normal(ks[0], (in_dim, attn_dim), jnp.float32),
        "bq": s * jax.random.normal(ks[1], (1, attn_dim), jnp.float32),
        "wk": s * jax.random.normal(ks[2], (d_cond, attn_dim), jnp.float32),
        "bk": s * jax.random.normal(ks[3], (1, attn_dim), jnp.float32),
        "wv": s * jax.random.normal(ks[4], (d_cond, attn_dim), jnp.float32),
        "bv": s * jax.random.normal(ks[5], (1, attn_dim), jnp.float32),
        "wo": s * jax.random.normal(ks[6], (attn_dim, in_dim), jnp.float32),
        "bo": s * jax.random.normal(ks[7], (1, in_dim), jnp.float32),
    }


if __name__ == "__main__":
    # Small shapes: batch=2, seq=16, cond_seq=8, in_dim=32, d_cond=16,
    # attn_dim=32, heads=8 (head_dim=4).
    B, L, Lc = 2, 16, 8
    in_dim, d_cond, attn_dim, n_heads = 32, 16, 32, 8

    key = jax.random.PRNGKey(0)
    kx, kc, kp, kp2 = jax.random.split(key, 4)
    x = jax.random.normal(kx, (B, L, in_dim), jnp.float32)
    cond = jax.random.normal(kc, (B, Lc, d_cond), jnp.float32)

    # Cross-attention path.
    params = init_params(kp, in_dim, d_cond, attn_dim)
    prepped = prepare_params(params, n_heads=n_heads)     # one-time transform
    out = jax.block_until_ready(cross_attention(x, cond, prepped, n_heads=n_heads))
    ref = cross_attention_ref(x, cond, params, n_heads=n_heads)
    assert out.shape == (B, L, in_dim)
    # Tolerance covers bf16 MXU operands (~0.4% relative) plus the EUP
    # approximate reciprocal (~1e-3 relative) vs the f32 reference.
    assert jnp.allclose(out, ref, atol=2e-2, rtol=2e-2), (
        f"max abs diff {jnp.max(jnp.abs(out - ref))}")

    # Self-attention path (cond=None) is only defined when d_cond == in_dim
    # (as in the PyTorch module), so it gets its own matching parameter set.
    params_self = init_params(kp2, in_dim, in_dim, attn_dim)
    prepped_self = prepare_params(params_self, n_heads=n_heads)
    out_self = jax.block_until_ready(
        cross_attention(x, None, prepped_self, n_heads=n_heads))
    ref_self = cross_attention_ref(x, None, params_self, n_heads=n_heads)
    assert jnp.allclose(out_self, ref_self, atol=2e-2, rtol=2e-2), (
        f"max abs diff {jnp.max(jnp.abs(out_self - ref_self))}")

    print("KERNEL_OK")
</pallas_src>

<mosaic_0001>
module attributes {stable_mosaic.version = 11 : i64} {
  func.func @_cross_attention_kernel(%arg0: i32, %arg1: memref<16x32xf32, #tpu.memory_space<vmem>>, %arg2: memref<8x16xf32, #tpu.memory_space<vmem>>, %arg3: memref<64x32xbf16, #tpu.memory_space<vmem>>, %arg4: memref<32x32xbf16, #tpu.memory_space<vmem>>, %arg5: memref<1x32xf32, #tpu.memory_space<vmem>>, %arg6: memref<16x32xbf16, #tpu.memory_space<vmem>>, %arg7: memref<1x32xf32, #tpu.memory_space<vmem>>, %arg8: memref<16x32xbf16, #tpu.memory_space<vmem>>, %arg9: memref<1x32xf32, #tpu.memory_space<vmem>>, %arg10: memref<32x32xbf16, #tpu.memory_space<vmem>>, %arg11: memref<1x32xf32, #tpu.memory_space<vmem>>, %arg12: memref<16x32xf32, #tpu.memory_space<vmem>>) attributes {dimension_semantics = [#tpu.dimension_semantics<parallel>], iteration_bounds = array<i64: 2>, scalar_prefetch = 0 : i64, scratch_operands = 0 : i64, tpu.core_type = #tpu.core_type<tc>, window_params = [{transform_indices = @transform_0, window_bounds = array<i64: 16, 32>}, {transform_indices = @transform_1, window_bounds = array<i64: 8, 16>}, {pipeline_mode = #tpu.pipeline_mode<synchronous>, transform_indices = @transform_2, window_bounds = array<i64: 64, 32>}, {pipeline_mode = #tpu.pipeline_mode<synchronous>, transform_indices = @transform_3, window_bounds = array<i64: 32, 32>}, {pipeline_mode = #tpu.pipeline_mode<synchronous>, transform_indices = @transform_4, window_bounds = array<i64: 1, 32>}, {pipeline_mode = #tpu.pipeline_mode<synchronous>, transform_indices = @transform_5, window_bounds = array<i64: 16, 32>}, {pipeline_mode = #tpu.pipeline_mode<synchronous>, transform_indices = @transform_6, window_bounds = array<i64: 1, 32>}, {pipeline_mode = #tpu.pipeline_mode<synchronous>, transform_indices = @transform_7, window_bounds = array<i64: 16, 32>}, {pipeline_mode = #tpu.pipeline_mode<synchronous>, transform_indices = @transform_8, window_bounds = array<i64: 1, 32>}, {pipeline_mode = #tpu.pipeline_mode<synchronous>, transform_indices = @transform_9, window_bounds = array<i64: 32, 32>}, {pipeline_mode = #tpu.pipeline_mode<synchronous>, transform_indices = @transform_10, window_bounds = array<i64: 1, 32>}, {transform_indices = @transform_11, window_bounds = array<i64: 16, 32>}]} {
    %c0 = arith.constant 0 : index
    %c0_0 = arith.constant 0 : index
    %0 = vector.load %arg1[%c0, %c0_0] : memref<16x32xf32, #tpu.memory_space<vmem>>, vector<16x32xf32>
    %1 = arith.truncf %0 : vector<16x32xf32> to vector<16x32xbf16>
    %c0_1 = arith.constant 0 : index
    %c0_2 = arith.constant 0 : index
    %2 = vector.load %arg2[%c0_1, %c0_2] : memref<8x16xf32, #tpu.memory_space<vmem>>, vector<8x16xf32>
    %3 = arith.truncf %2 : vector<8x16xf32> to vector<8x16xbf16>
    %c0_3 = arith.constant 0 : index
    %c0_4 = arith.constant 0 : index
    %4 = vector.load %arg4[%c0_3, %c0_4] : memref<32x32xbf16, #tpu.memory_space<vmem>>, vector<32x32xbf16>
    %cst = arith.constant dense<0.000000e+00> : vector<16x32xf32>
    %5 = tpu.matmul %1, %4, %cst {dimension_numbers = #tpu.dot_dimension_numbers<[1], [0], [0], [1], [0, 0, 1, 1], [], []>} : vector<16x32xbf16>, vector<32x32xbf16>, vector<16x32xf32> -> vector<16x32xf32>
    %c0_5 = arith.constant 0 : index
    %c0_6 = arith.constant 0 : index
    %6 = vector.load %arg5[%c0_5, %c0_6] : memref<1x32xf32, #tpu.memory_space<vmem>>, vector<1x32xf32>
    %7 = vector.broadcast %6 : vector<1x32xf32> to vector<16x32xf32>
    %8 = arith.addf %5, %7 : vector<16x32xf32>
    %c0_7 = arith.constant 0 : index
    %c0_8 = arith.constant 0 : index
    %9 = vector.load %arg6[%c0_7, %c0_8] : memref<16x32xbf16, #tpu.memory_space<vmem>>, vector<16x32xbf16>
    %cst_9 = arith.constant dense<0.000000e+00> : vector<8x32xf32>
    %10 = tpu.matmul %3, %9, %cst_9 {dimension_numbers = #tpu.dot_dimension_numbers<[1], [0], [0], [1], [0, 0, 1, 1], [], []>} : vector<8x16xbf16>, vector<16x32xbf16>, vector<8x32xf32> -> vector<8x32xf32>
    %c0_10 = arith.constant 0 : index
    %c0_11 = arith.constant 0 : index
    %11 = vector.load %arg7[%c0_10, %c0_11] : memref<1x32xf32, #tpu.memory_space<vmem>>, vector<1x32xf32>
    %12 = vector.broadcast %11 : vector<1x32xf32> to vector<8x32xf32>
    %13 = arith.addf %10, %12 : vector<8x32xf32>
    %c0_12 = arith.constant 0 : index
    %c0_13 = arith.constant 0 : index
    %14 = vector.load %arg8[%c0_12, %c0_13] : memref<16x32xbf16, #tpu.memory_space<vmem>>, vector<16x32xbf16>
    %cst_14 = arith.constant dense<0.000000e+00> : vector<8x32xf32>
    %15 = tpu.matmul %3, %14, %cst_14 {dimension_numbers = #tpu.dot_dimension_numbers<[1], [0], [0], [1], [0, 0, 1, 1], [], []>} : vector<8x16xbf16>, vector<16x32xbf16>, vector<8x32xf32> -> vector<8x32xf32>
    %c0_15 = arith.constant 0 : index
    %c0_16 = arith.constant 0 : index
    %16 = vector.load %arg9[%c0_15, %c0_16] : memref<1x32xf32, #tpu.memory_space<vmem>>, vector<1x32xf32>
    %17 = vector.broadcast %16 : vector<1x32xf32> to vector<8x32xf32>
    %18 = arith.addf %15, %17 : vector<8x32xf32>
    %c0_17 = arith.constant 0 : index
    %c0_18 = arith.constant 0 : index
    %19 = vector.load %arg3[%c0_17, %c0_18] : memref<64x32xbf16, #tpu.memory_space<vmem>>, vector<64x32xbf16>
    %20 = arith.extf %19 : vector<64x32xbf16> to vector<64x32xf32>
    %21 = tpu.concatenate %13, %13, %13, %13, %13, %13, %13, %13 in 0 : vector<8x32xf32>, vector<8x32xf32>, vector<8x32xf32>, vector<8x32xf32>, vector<8x32xf32>, vector<8x32xf32>, vector<8x32xf32>, vector<8x32xf32> -> vector<64x32xf32>
    %22 = arith.mulf %21, %20 : vector<64x32xf32>
    %23 = arith.truncf %22 : vector<64x32xf32> to vector<64x32xbf16>
    %24 = tpu.concatenate %18, %18, %18, %18, %18, %18, %18, %18 in 0 : vector<8x32xf32>, vector<8x32xf32>, vector<8x32xf32>, vector<8x32xf32>, vector<8x32xf32>, vector<8x32xf32>, vector<8x32xf32>, vector<8x32xf32> -> vector<64x32xf32>
    %25 = arith.mulf %24, %20 : vector<64x32xf32>
    %26 = arith.truncf %25 : vector<64x32xf32> to vector<64x32xbf16>
    %27 = arith.truncf %8 : vector<16x32xf32> to vector<16x32xbf16>
    %cst_19 = arith.constant dense<0.000000e+00> : vector<16x64xf32>
    %28 = tpu.matmul %27, %23, %cst_19 {dimension_numbers = #tpu.dot_dimension_numbers<[1], [1], [0], [0], [0, 0, 1, 0], [], []>} : vector<16x32xbf16>, vector<64x32xbf16>, vector<16x64xf32> -> vector<16x64xf32>
    %cst_20 = arith.constant dense<0xFF800000> : vector<16xf32>
    %29 = vector.multi_reduction <maximumf>, %28, %cst_20 [1] : vector<16x64xf32> to vector<16xf32>
    %30 = vector.shape_cast %29 : vector<16xf32> to vector<16x1xf32>
    %31 = vector.broadcast %30 : vector<16x1xf32> to vector<16x64xf32>
    %32 = arith.subf %28, %31 : vector<16x64xf32>
    %33 = math.exp %32 : vector<16x64xf32>
    %34 = arith.truncf %33 : vector<16x64xf32> to vector<16x64xbf16>
    %cst_21 = arith.constant dense<0.000000e+00> : vector<16x32xf32>
    %35 = tpu.matmul %34, %26, %cst_21 {dimension_numbers = #tpu.dot_dimension_numbers<[1], [0], [0], [1], [0, 0, 1, 1], [], []>} : vector<16x64xbf16>, vector<64x32xbf16>, vector<16x32xf32> -> vector<16x32xf32>
    %cst_22 = arith.constant dense<0.000000e+00> : vector<16x32xf32>
    %36 = tpu.matmul %34, %19, %cst_22 {dimension_numbers = #tpu.dot_dimension_numbers<[1], [0], [0], [1], [0, 0, 1, 1], [], []>} : vector<16x64xbf16>, vector<64x32xbf16>, vector<16x32xf32> -> vector<16x32xf32>
    %37 = tpu.reciprocal %36 {approx = true} : vector<16x32xf32> -> vector<16x32xf32>
    %38 = arith.mulf %35, %37 : vector<16x32xf32>
    %39 = arith.truncf %38 : vector<16x32xf32> to vector<16x32xbf16>
    %c0_23 = arith.constant 0 : index
    %c0_24 = arith.constant 0 : index
    %40 = vector.load %arg10[%c0_23, %c0_24] : memref<32x32xbf16, #tpu.memory_space<vmem>>, vector<32x32xbf16>
    %cst_25 = arith.constant dense<0.000000e+00> : vector<16x32xf32>
    %41 = tpu.matmul %39, %40, %cst_25 {dimension_numbers = #tpu.dot_dimension_numbers<[1], [0], [0], [1], [0, 0, 1, 1], [], []>} : vector<16x32xbf16>, vector<32x32xbf16>, vector<16x32xf32> -> vector<16x32xf32>
    %c0_26 = arith.constant 0 : index
    %c0_27 = arith.constant 0 : index
    %42 = vector.load %arg11[%c0_26, %c0_27] : memref<1x32xf32, #tpu.memory_space<vmem>>, vector<1x32xf32>
    %43 = vector.broadcast %42 : vector<1x32xf32> to vector<16x32xf32>
    %44 = arith.addf %41, %43 : vector<16x32xf32>
    %c0_28 = arith.constant 0 : index
    %c0_29 = arith.constant 0 : index
    %45 = vector.load %arg12[%c0_28, %c0_29] : memref<16x32xf32, #tpu.memory_space<vmem>>, vector<16x32xf32>
    tpu.vector_store %arg12[%c0_28, %c0_29], %44 {strides = array<i32>} : memref<16x32xf32, #tpu.memory_space<vmem>>, vector<16x32xf32>,
    return
  }
  func.func @transform_0(%arg0: i32) -> (i32, i32) {
    %c0_i32 = arith.constant 0 : i32
    %c0_i32_0 = arith.constant 0 : i32
    return %arg0, %c0_i32 : i32, i32
  }
  func.func @transform_1(%arg0: i32) -> (i32, i32) {
    %c0_i32 = arith.constant 0 : i32
    %c0_i32_0 = arith.constant 0 : i32
    return %arg0, %c0_i32 : i32, i32
  }
  func.func @transform_2(%arg0: i32) -> (i32, i32) {
    %c0_i32 = arith.constant 0 : i32
    %c0_i32_0 = arith.constant 0 : i32
    %c0_i32_1 = arith.constant 0 : i32
    return %c0_i32, %c0_i32_0 : i32, i32
  }
  func.func @transform_3(%arg0: i32) -> (i32, i32) {
    %c0_i32 = arith.constant 0 : i32
    %c0_i32_0 = arith.constant 0 : i32
    %c0_i32_1 = arith.constant 0 : i32
    return %c0_i32, %c0_i32_0 : i32, i32
  }
  func.func @transform_4(%arg0: i32) -> (i32, i32) {
    %c0_i32 = arith.constant 0 : i32
    %c0_i32_0 = arith.constant 0 : i32
    %c0_i32_1 = arith.constant 0 : i32
    return %c0_i32, %c0_i32_0 : i32, i32
  }
  func.func @transform_5(%arg0: i32) -> (i32, i32) {
    %c0_i32 = arith.constant 0 : i32
    %c0_i32_0 = arith.constant 0 : i32
    %c0_i32_1 = arith.constant 0 : i32
    return %c0_i32, %c0_i32_0 : i32, i32
  }
  func.func @transform_6(%arg0: i32) -> (i32, i32) {
    %c0_i32 = arith.constant 0 : i32
    %c0_i32_0 = arith.constant 0 : i32
    %c0_i32_1 = arith.constant 0 : i32
    return %c0_i32, %c0_i32_0 : i32, i32
  }
  func.func @transform_7(%arg0: i32) -> (i32, i32) {
    %c0_i32 = arith.constant 0 : i32
    %c0_i32_0 = arith.constant 0 : i32
    %c0_i32_1 = arith.constant 0 : i32
    return %c0_i32, %c0_i32_0 : i32, i32
  }
  func.func @transform_8(%arg0: i32) -> (i32, i32) {
    %c0_i32 = arith.constant 0 : i32
    %c0_i32_0 = arith.constant 0 : i32
    %c0_i32_1 = arith.constant 0 : i32
    return %c0_i32, %c0_i32_0 : i32, i32
  }
  func.func @transform_9(%arg0: i32) -> (i32, i32) {
    %c0_i32 = arith.constant 0 : i32
    %c0_i32_0 = arith.constant 0 : i32
    %c0_i32_1 = arith.constant 0 : i32
    return %c0_i32, %c0_i32_0 : i32, i32
  }
  func.func @transform_10(%arg0: i32) -> (i32, i32) {
    %c0_i32 = arith.constant 0 : i32
    %c0_i32_0 = arith.constant 0 : i32
    %c0_i32_1 = arith.constant 0 : i32
    return %c0_i32, %c0_i32_0 : i32, i32
  }
  func.func @transform_11(%arg0: i32) -> (i32, i32) {
    %c0_i32 = arith.constant 0 : i32
    %c0_i32_0 = arith.constant 0 : i32
    return %arg0, %c0_i32 : i32, i32
  }
}

</mosaic_0001>

<bundles_post_ra>
// kernel: tpu_custom_call.1
= control target key start
LH: loop header
LB: loop body
LE: loop exit
PB: predicated region body
PF: predicated region fallthrough
CT: control target
= control target key end

     0   :  { %16 = vsyncpa [#allocation3], 0  ;;  %s1719_s0 = inlined_call_operand.vmem [shape: f32[32,32], index: 0, kind: input, shape index: {}]   ;;  %s1720_s1 = inlined_call_operand.vmem [shape: f32[16,16], index: 1, kind: input, shape index: {}]   ;;  %s1721_s2 = inlined_call_operand.vmem [shape: bf16[64,32], index: 2, kind: input, shape index: {}]   ;;  %s1722_s3 = inlined_call_operand.hbm [shape: bf16[32,32], index: 3, kind: input, shape index: {}]   ;;  %s1723_s4 = inlined_call_operand.vmem [shape: f32[1,32], index: 4, kind: input, shape index: {}]   ;;  %s1724_s5 = inlined_call_operand.hbm [shape: bf16[16,32], index: 5, kind: input, shape index: {}]   ;;  %s1725_s6 = inlined_call_operand.vmem [shape: f32[1,32], index: 6, kind: input, shape index: {}]   ;;  %s1726_s7 = inlined_call_operand.vmem [shape: bf16[16,32], index: 7, kind: input, shape index: {}]   ;;  %s1727_s8 = inlined_call_operand.vmem [shape: f32[1,32], index: 8, kind: input, shape index: {}]   ;;  %s1728_s9 = inlined_call_operand.vmem [shape: bf16[32,32], index: 9, kind: input, shape index: {}]   ;;  %s1729_s10 = inlined_call_operand.vmem [shape: f32[1,32], index: 10, kind: input, shape index: {}]   ;;  %s1730_s11 = inlined_call_operand.hbm [shape: f32[32,32], index: 11, kind: output, shape index: {}]  }
   0x1   :  { %17 = vsyncpa [#allocation6], 0 }
   0x2   :  { %18 = vsyncpa [#allocation4], 0 }
   0x3   :  { %20 = vsyncpa [#allocation4 + $0x1], 0  ;;  %s1440_s17 = smov 0   ;;  %s1442_s18 = smov 0  }
   0x4   :  { %s1444_s19 = smov 0   ;;  %s1446_s20 = smov 0  }
   0x5 LB: > { %1739 = sst [smem:[#allocation11_spill]] %s1357_s17  ;;  %s1461_s21 = sadd.s32 4294967295, %s1369_s20   ;;  %s1369_s20 = sphi %s1446_s20, %s1757_s20   ;;  %s1365_s19 = sphi %s1444_s19, %s1759_s19   ;;  %s1361_s18 = sphi %s1442_s18, %s1761_s18   ;;  %s1357_s17 = sphi %s1440_s17, %s1760_s17  }
   0x6   : > { %1740 = sst [smem:[#allocation12_spill]] %s1365_s19  ;;  %s1027_s22 = sadd.s32 4294967294, %s1369_s20  }
   0x7   : > { %s1465_s23 = sadd.s32 1, %s1369_s20   ;;  %s274_s24 = sadd.s32 1, %s1365_s19 }
   0x8   : > { %1741 = sst [smem:[#allocation13_spill]] %s1465_s23  ;;  %s271_s25 = ssub.s32 %s1369_s20, %s1465_s23 }
   0x9   : > { %p284_p0 = scmp.ne.s32.totalorder %s1365_s19, %s1361_s18  ;;  %p272_p1 = scmp.eq.s32.totalorder %s271_s25, 0 }
   0xa   : > { %p285_p2 = scmp.eq.s32.totalorder %s1461_s21, 1  ;;  %p290_p3 = scmp.ne.s32.totalorder %s1361_s18, %s1357_s17 }
   0xb   : > { %p291_p4 = scmp.eq.s32.totalorder %s1027_s22, 1  ;;  %p1028_p7 = scmp.ge.s32.totalorder %s1369_s20, 1 }
   0xc   : > { %s1476_s26 = scalar_select %p272_p1, %s1365_s19, %s274_s24  }
   0xd   : > { %p1478_p5 = por %p285_p2, %p284_p0  ;;  %p1482_p6 = por %p291_p4, %p290_p3 }
   0xe   : > { %1742 = sst [smem:[#allocation14_spill]] %s1476_s26  ;;  %p298_p8 = scmp.lt.s32.totalorder %s1369_s20, 3 }
   0xf   : > { %s1743_s27 = scalar_select %p1478_p5, 1, 0 }
  0x10   : > { %s1744_s28 = scalar_select %p1482_p6, 1, 0 }
  0x11   : > { %p1732_p9 = scmp.eq.s32.totalorder %s1461_s21, 0  ;;  %p1489_p10 = pnand %p1028_p7, %p298_p8 }
  0x12   : > { %1745 = sst [smem:[#allocation15_spill]] %s1744_s28  ;;  %s1371_s30 = smov [#allocation2]  }
  0x13   : > { %s1746_s29 = scalar_select %p1489_p10, 1, 0 }
  0x14   : > { %s313_s12 = sshll.u32 %s1371_s30, 4  ;;  %p1165_p11 = pneg %p1489_p10  ;;  %s314_s12 = int_to_ptr.vmem [resolvable:$true] %s313_s12 }
  0x15   : > { %s1372_s14 = smov [#allocation5]   ;;  %s1243_s24 = scalar_lea.hbm %s1722_s3, 256 }
  0x16   : > { %p1497_p12 = pnand %p1732_p9, %p1165_p11  ;;  %s329_s15 = sshll.u32 %s1372_s14, 4  ;;  %s1501_s15 = int_to_ptr.vmem [resolvable:$true] %s329_s15 }
  0x17   : > { %p1244_p13 = scmp.ne.s32.totalorder %s1722_s3, %s1243_s24  ;;  %p1250_p3 = scmp.lt.u32.totalorder %s1243_s24, %s1722_s3 }
  0x18   : > { %p1245_p0 = pneg %p1497_p12 }
  0x1a   : > { %p1246_p1 = pnand %p1245_p0, %p1244_p13 }
  0x1c   : > { %p1247_p2 = pneg %p1246_p1 }
  0x1e   : > { %p1252_p4 = pnand %p1250_p3, %p1247_p2 }
  0x20   : > { %1255 = shalt.err (!%p1252_p4)
}
  0x21   : > { %s1256_s14 = scalar_lea.vmem %s314_s12, 256  ;;  %p1264_p9 = scmp.lt.s32.totalorder %s314_s12, %s314_s12 }
  0x22   : > { %p1257_p7 = scmp.ne.s32.totalorder %s314_s12, %s1256_s14  ;;  %p1265_p6 = scmp.lt.s32.totalorder %s1256_s14, %s1256_s14 }
  0x24   : > { %p1259_p8 = pnand %p1257_p7, %p1245_p0  ;;  %p1266_p5 = por %p1265_p6, %p1264_p9 }
  0x26   : > { %p1260_p11 = pneg %p1259_p8 }
  0x28   : > { %p1267_p10 = pnand %p1266_p5, %p1260_p11 }
  0x2a   : > { %1270 = shalt.err (!%p1267_p10)
}
  0x2b   : > { %s1373_s16 = smov 64   ;;  %s1374_s22 = smov 4  }
  0x2c   : > { %1168 = dma.hbm_to_vmem [thread:$0]  (!%p1497_p12), %s1722_s3, 256, %s314_s12, [#allocation3], %s1373_s16, %s1373_s16, %s1374_s22  }
  0x2d   : > { %s1271_s30 = scalar_lea.hbm %s1724_s5, 128 }
  0x2e   : > { %p1272_p13 = scmp.ne.s32.totalorder %s1724_s5, %s1271_s30  ;;  %p1278_p9 = scmp.lt.u32.totalorder %s1271_s30, %s1724_s5 }
  0x30   : > { %p1274_p5 = pnand %p1272_p13, %p1245_p0 }
  0x32   : > { %p1275_p6 = pneg %p1274_p5 }
  0x34   : > { %p1280_p10 = pnand %p1278_p9, %p1275_p6 }
  0x36   : > { %1283 = shalt.err (!%p1280_p10)
}
  0x37   : > { %s1284_s12 = scalar_lea.vmem %s1501_s15, 128  ;;  %p1292_p4 = scmp.lt.s32.totalorder %s1501_s15, %s1501_s15 }
  0x38   : > { %p1285_p1 = scmp.ne.s32.totalorder %s1501_s15, %s1284_s12  ;;  %p1293_p7 = scmp.lt.s32.totalorder %s1284_s12, %s1284_s12 }
  0x3a   : > { %p1287_p2 = pnand %p1285_p1, %p1245_p0  ;;  %p1294_p8 = por %p1293_p7, %p1292_p4 }
  0x3c   : > { %p1288_p3 = pneg %p1287_p2 }
  0x3e   : > { %p1295_p11 = pnand %p1294_p8, %p1288_p3 }
  0x40   : > { %1298 = shalt.err (!%p1295_p11)
}
  0x41   : > { %1171 = dma.hbm_to_vmem [thread:$0]  (!%p1497_p12), %s1724_s5, 128, %s1501_s15, [#allocation6], %s1373_s16, %s1373_s16, %s1374_s22  }
  0x42   : > { %p1748_p13 = scmp.ne.s32.totalorder %s1746_s29, 0 }
  0x43   : > { %p1749_p5 = scmp.eq.s32.totalorder (!%p1748_p13), %s1461_s21, 0 }
  0x44   : > { %376 = sbr.rel (%p1748_p13) target bundleno = 1191 (0x4a7), region = 64 }
  0x4b   : > { %1344 = dma.done.wait (%p1749_p5), [#allocation3], 256   ;;  %p1750_p0 = pmov %p1749_p5 }
  0x4d   : > { %1346 = vsyncadd (%p1750_p0), [#allocation3], 4294967040  ;;  %p1751_p6 = pmov %p1750_p0 }
  0x4e   : > { %p1752_p9 = pmov %p1750_p0 }
  0x4f   : > { %1348 = dma.done.wait (%p1751_p6), [#allocation6], 128  }
  0x50   : > { %1350 = vsyncadd (%p1752_p9), [#allocation6], 4294967168  ;;  %p430_p10 = scmp.lt.s32.totalorder %s1461_s21, 1  ;;  %v1375_v0 = vmov 0.0   ;;  %vm1376_vm0 = vmmov 0   ;;  %s1036_s28 = sshll.u32 %s1461_s21, 1 }
  0x51   : > { %1099 = vmatprep.subr.bf16.mxu1 %v1375_v0  ;;  %1101 = vmatprep.mubr.msk.bf16.mxu1 %vm1376_vm0, %v1375_v0  ;;  %p425_p12 = scmp.lt.s32.totalorder %s1036_s28, 3  ;;  %v1221_v1 = vld [vmem:[#allocation5] sm:$0xff]   ;;  %vm524_vm1 = vcmask 130048   ;;  %v1222_v4 = vld [vmem:[#allocation2] sm:$0xff]   ;;  %v1223_v5 = vld [vmem:[#allocation2 + $0x8] sm:$0xff]   ;;  %vm464_vm2 = vcmask 261120  }
  0x52   : > { %s431_s29 = scalar_select %p430_p10, %s1461_s21, 1  ;;  %1091 = vmatprep.subr.bf16.mxu0 %v1375_v0  ;;  %1095 = vmatprep.mubr.msk.bf16.mxu0 %vm1376_vm0, %v1375_v0  ;;  %v1224_v9 = vld [vmem:[%s1726_s7] sm:$0xff]   ;;  %v1604_v15 = vld [vmem:[%s1721_s2 + $0x8] sm:$0xff]   ;;  %v1615_v32 = vld [vmem:[%s1721_s2 + $0x10] sm:$0xff]   ;;  %vm720_vm3 = vcmask 523264  }
  0x53   : > { %s1763_s28 = smov (!%p425_p12, %s1036_s28), 3  ;;  %1100 = vmatpush3.bf16.msra.mxu1 %v1221_v1  ;;  %1092 = vmatpush3.bf16.msra.mxu0 %v1222_v4  ;;  %v1594_v10 = vld [vmem:[%s1721_s2] sm:$0xff]   ;;  %v633_v22 = vunpack.c.l.bf16 %v1604_v15  ;;  %v634_v23 = vunpack.c.h.bf16 %v1604_v15  ;;  %v635_v37 = vunpack.c.l.bf16 %v1615_v32  ;;  %v636_v38 = vunpack.c.h.bf16 %v1615_v32  ;;  %v1624_v43 = vld [vmem:[%s1721_s2 + $0x18] sm:$0xff]   ;;  %p1753_p2 = scmp.ne.s32.totalorder %s1743_s27, 0 }
  0x54   : > { %s1038_s13 = sshll.u32 %s431_s29, 3  ;;  %s1037_s19 = sshll.u32 %s1763_s28, 3  ;;  %1105 = vmatprep.subr.bf16.mxu1 %v1375_v0  ;;  %1093 = vmatprep.subr.bf16.mxu0 %v1375_v0  ;;  %v1043_v11 = vld [vmem:[%s1725_s6] ss:$0 sm:$0xff]  ;;  %v631_v12 = vunpack.c.l.bf16 %v1594_v10  ;;  %v632_v13 = vunpack.c.h.bf16 %v1594_v10  ;;  %v637_v45 = vunpack.c.l.bf16 %v1624_v43  ;;  %v638_v46 = vunpack.c.h.bf16 %v1624_v43 }
  0x55   : > { %s433_s22 = scalar_lea.vmem %s1720_s1, %s1038_s13  ;;  %s428_s25 = scalar_lea.vmem %s1719_s0, %s1037_s19  ;;  %v1039_v24 = vld [vmem:[%s1723_s4] ss:$0 sm:$0xff] }
  0x56   : > { %v439_v2 = vld [vmem:[%s433_s22] sm:$0xff]  ;;  %v437_v7 = vld [vmem:[%s428_s25 + $0x8] sm:$0xff]  ;;  %s421_s28 = sand.u32 1, %s1361_s18   ;;  %s1065_s19 = sshll.u32 %s1461_s21, 8 }
  0x57   : > { %v440_v3 = vpack.c.bf16 %v439_v2, %v439_v2  ;;  %v436_v6 = vld [vmem:[%s428_s25] sm:$0xff]  ;;  %1094 = vmatpush3.bf16.msra.mxu0 %v1223_v5  ;;  %s1035_s29 = sshll.u32 %s421_s28, 4  ;;  %s1674_s25 = scalar_lea.hbm %s1730_s11, %s1065_s19 }
  0x58   : > { %v438_v8 = vpack.c.bf16 %v437_v7, %v436_v6  ;;  %1111 = vmatprep.subr.bf16.mxu0 %v1375_v0  ;;  %v1046_v52 = vld [vmem:[%s1727_s8] ss:$0 sm:$0xff]  ;;  %s423_s16 = scalar_lea.vmem [#allocation7], %s1035_s29  ;;  %s1678_s21 = scalar_lea.sflag [#allocation4], %s421_s28 }
  0x59   : > { %1102 = vmatmul.mubr.msk.bf16.vlgmr.msra.gmra.mrb[0].mxu1 %vm524_vm1, %v440_v3  ;;  %s931_s22 = sshll.u32 %s423_s16, 4  ;;  %s1377_s14 = smov [#allocation7]   ;;  %s1669_s22 = int_to_ptr.vmem [resolvable:$true] %s931_s22 }
  0x5a   : > { %1107 = vmatprep.mubr.msk.bf16.mxu1 %vm1376_vm0, %v1375_v0  ;;  %1096 = vmatmul.mubr.msk.bf16.vlgmr.msra.gmra.mrb[0].mxu0 %vm464_vm2, %v438_v8  ;;  %s1299_s30 = scalar_lea.vmem %s1669_s22, 256  ;;  %s1303_s12 = sshll.u32 %s1377_s14, 4  ;;  %s1304_s12 = int_to_ptr.vmem [resolvable:$false] %s1303_s12 }
  0x5b   : > { %1119 = vmatprep.mubr.msk.bf16.mxu0 %vm1376_vm0, %v1375_v0  ;;  %1106 = vmatpush3.bf16.msra.mxu1 %v1224_v9  ;;  %p1300_p1 = scmp.ne.s32.totalorder %s1669_s22, %s1299_s30  ;;  %s1305_s17 = scalar_lea.vmem %s1304_s12, 512 }
  0x5c   : > { %1123 = vmatprep.subr.bf16.mxu1 %v1375_v0  ;;  %p1306_p7 = scmp.lt.s32.totalorder %s1669_s22, %s1304_s12  ;;  %p1307_p8 = scmp.lt.s32.totalorder %s1305_s17, %s1299_s30 }
  0x5d   : > { %p1301_p3 = pnand %p1300_p1, %p1753_p2 }
  0x5e   : > { %p1308_p11 = por %p1307_p8, %p1306_p7 }
  0x5f   : > { %p1302_p4 = pneg %p1301_p3 }
  0x61   : > { %1108 = vmatmul.mubr.msk.bf16.vlgmr.msra.gmra.mrb[4].mxu1 %vm524_vm1, %v440_v3  ;;  %p1309_p13 = pnand %p1308_p11, %p1302_p4 }
  0x62   : > { %1131 = vmatprep.mubr.msk.bf16.mxu1 %vm1376_vm0, %v1375_v0 }
 0x12c   : > { %v562_v14 = vpop.f32.mrb[0].mxu1 }
 0x12d   : > { %v563_v16 = vadd.f32 %v1043_v11, %v562_v14  ;;  %v1103_v17 = vpop.f32.mrb[1].mxu1  ;;  %v502_v26 = vpop.f32.mrb[0].mxu0 }
 0x12e   : > { %v565_v18 = vpop.f32.mrb[2].mxu1  ;;  %v503_v30 = vadd.f32 %v1039_v24, %v502_v26  ;;  %v1097_v31 = vpop.f32.mrb[1].mxu0 }
 0x12f   : > { %v1104_v19 = vpop.f32.mrb[3].mxu1  ;;  %v639_v20 = vmul.f32 %v631_v12, %v563_v16  ;;  %v640_v21 = vmul.f32 %v632_v13, %v563_v16  ;;  %v641_v28 = vmul.f32 %v633_v22, %v563_v16  ;;  %v642_v29 = vmul.f32 %v634_v23, %v563_v16  ;;  %v505_v33 = vpop.f32.mrb[2].mxu0 }
 0x130   : > { %v506_v34 = vadd.f32 %v1039_v24, %v505_v33  ;;  %v1098_v35 = vpop.f32.mrb[3].mxu0  ;;  %v643_v41 = vmul.f32 %v635_v37, %v563_v16  ;;  %v644_v42 = vmul.f32 %v636_v38, %v563_v16  ;;  %v645_v48 = vmul.f32 %v637_v45, %v563_v16 }
 0x131   : > { %v647_v25 = vpack.c.bf16 %v640_v21, %v639_v20  ;;  %v648_v36 = vpack.c.bf16 %v642_v29, %v641_v28  ;;  %v646_v49 = vmul.f32 %v638_v46, %v563_v16 }
 0x132   : > { %v663_v39 = vpack.c.bf16 %v506_v34, %v503_v30  ;;  %v649_v44 = vpack.c.bf16 %v644_v42, %v643_v41 }
 0x133   : > { %v668_v27 = vsel %vm464_vm2, %v647_v25, 0  ;;  %v671_v40 = vsel %vm464_vm2, %v648_v36, 0  ;;  %v650_v50 = vpack.c.bf16 %v646_v49, %v645_v48  ;;  %v1056_v36 = vld [vmem:[%s1729_s10] ss:$0 sm:$0xff] }
 0x134   : > { %1112 = vmatpush3.bf16.xpose.msra.mxu0 %v668_v27  ;;  %v674_v47 = vsel %vm464_vm2, %v649_v44, 0  ;;  %v617_v53 = vpop.f32.mrb[4].mxu1 }
 0x135   : > { %1113 = vmatprep.subr.bf16.mxu0 %v1375_v0  ;;  %v677_v51 = vsel %vm464_vm2, %v650_v50, 0  ;;  %v618_v54 = vadd.f32 %v1046_v52, %v617_v53  ;;  %v1109_v55 = vpop.f32.mrb[5].mxu1 }
 0x136   : > { %v620_v56 = vpop.f32.mrb[6].mxu1 }
 0x137   : > { %v651_v57 = vmul.f32 %v631_v12, %v618_v54  ;;  %v652_v58 = vmul.f32 %v632_v13, %v618_v54  ;;  %v653_v59 = vmul.f32 %v633_v22, %v618_v54  ;;  %v654_v60 = vmul.f32 %v634_v23, %v618_v54  ;;  %v1110_v61 = vpop.f32.mrb[7].mxu1 }
 0x138   : > { %v655_v7 = vmul.f32 %v635_v37, %v618_v54  ;;  %v656_v8 = vmul.f32 %v636_v38, %v618_v54  ;;  %v657_v11 = vmul.f32 %v637_v45, %v618_v54  ;;  %v658_v12 = vmul.f32 %v638_v46, %v618_v54 }
 0x139   : > { %v659_v62 = vpack.c.bf16 %v652_v58, %v651_v57  ;;  %v660_v63 = vpack.c.bf16 %v654_v60, %v653_v59 }
 0x13a   : > { %v661_v9 = vpack.c.bf16 %v656_v8, %v655_v7  ;;  %v662_v13 = vpack.c.bf16 %v658_v12, %v657_v11 }
 0x13b   : > { %1124 = vmatpush3.bf16.msra.mxu1 %v659_v62 }
 0x13c   : > { %1114 = vmatpush3.bf16.xpose.msra.mxu0 %v671_v40  ;;  %1125 = vmatprep.subr.bf16.mxu1 %v1375_v0 }
 0x13d   : > { %1115 = vmatprep.subr.bf16.mxu0 %v1375_v0 }
 0x13f   : > { %1126 = vmatpush3.bf16.msra.mxu1 %v660_v63 }
 0x140   : > { %1127 = vmatprep.subr.bf16.mxu1 %v1375_v0 }
 0x143   : > { %1128 = vmatpush3.bf16.msra.mxu1 %v661_v9 }
 0x144   : > { %1116 = vmatpush3.bf16.xpose.msra.mxu0 %v674_v47  ;;  %1129 = vmatprep.subr.bf16.mxu1 %v1375_v0 }
 0x145   : > { %1117 = vmatprep.subr.bf16.mxu0 %v1375_v0 }
 0x147   : > { %1130 = vmatpush3.bf16.msra.mxu1 %v662_v13 }
 0x148   : > { %1135 = vmatprep.subr.bf16.mxu1 %v1375_v0 }
 0x14c   : > { %1118 = vmatpush3.bf16.xpose.msra.mxu0 %v677_v51 }
 0x14d   : > { %1147 = vmatprep.subr.bf16.mxu0 %v1375_v0 }
 0x153   : > { %1120 = vmatmul.mubr.msk.bf16.vlgmr.msra.gmra.mrb[4].mxu0 %vm464_vm2, %v663_v39 }
 0x154   : > { %1151 = vmatprep.mubr.msk.bf16.mxu0 %vm1376_vm0, %v1375_v0 }
 0x226   : > { %v713_v1 = vpop.f32.mrb[4].mxu0 }
 0x227   : > { %v1121_v2 = vpop.f32.mrb[5].mxu0  ;;  %v721_v3 = vsel %vm720_vm3, %v713_v1, -inf }
 0x228   : > { %722 = vmax.xlane.f32.xlu0 %v721_v3  ;;  %v716_v4 = vpop.f32.mrb[6].mxu0 }
 0x229   : > { %v1122_v5 = vpop.f32.mrb[7].mxu0  ;;  %v724_v6 = vsel %vm720_vm3, %v716_v4, -inf }
 0x22c   : > { %725 = vmax.xlane.f32.xlu0 %v724_v6 }
 0x2b5   : > { %v723_v14 = vpop.xlane.xlu0 %722 }
 0x2b6   : > { %v727_v16 = vsub.f32 %v713_v1, %v723_v14 }
 0x2b8   : > { %v729_v17 = vmul.f32 1.442695, %v727_v16 }
 0x2b9   : > { %v726_v18 = vpop.xlane.xlu0 %725 }
 0x2ba   : > { %v728_v19 = vsub.f32 %v716_v4, %v726_v18  ;;  %1235 = vpow2.f32 %v729_v17 }
 0x2bc   : > { %v731_v20 = vmul.f32 1.442695, %v728_v19 }
 0x2be   : > { %1237 = vpow2.f32 %v731_v20 }
 0x2c4   : > { %v1236_v21 = vpop.eup %1235 }
 0x2c8   : > { %v1238_v22 = vpop.eup %1237 }
 0x2c9   : > { %v733_v23 = vpack.c.bf16 %v1238_v22, %v1236_v21 }
 0x2cb   : > { %1132 = vmatmul.mubr.msk.bf16.vlgmr.msra.gmra.mrb[8].mxu1 %vm720_vm3, %v733_v23 }
 0x2cc   : > { %1136 = vmatpush3.bf16.msra.mxu1 %v1594_v10  ;;  %1143 = vmatprep.mubr.msk.bf16.mxu1 %vm1376_vm0, %v1375_v0  ;;  %v1229_v10 = vld [vmem:[%s1728_s9] sm:$0xff]  }
 0x2cd   : > { %1137 = vmatprep.subr.bf16.mxu1 %v1375_v0  ;;  %1148 = vmatpush3.bf16.msra.mxu0 %v1229_v10 }
 0x2ce   : > { %1149 = vmatprep.subr.bf16.mxu0 %v1375_v0 }
 0x2d0   : > { %1138 = vmatpush3.bf16.msra.mxu1 %v1604_v15  ;;  %v1230_v15 = vld [vmem:[%s1728_s9 + $0x8] sm:$0xff]  }
 0x2d1   : > { %1139 = vmatprep.subr.bf16.mxu1 %v1375_v0  ;;  %1150 = vmatpush3.bf16.msra.mxu0 %v1230_v15 }
 0x2d4   : > { %1140 = vmatpush3.bf16.msra.mxu1 %v1615_v32 }
 0x2d5   : > { %1141 = vmatprep.subr.bf16.mxu1 %v1375_v0 }
 0x2d8   : > { %1142 = vmatpush3.bf16.msra.mxu1 %v1624_v43 }
 0x2db   : > { %1144 = vmatmul.mubr.msk.bf16.vlgmr.msra.gmra.mrb[12].mxu1 %vm720_vm3, %v733_v23 }
 0x39e   : > { %v771_v24 = vpop.f32.mrb[8].mxu1 }
 0x39f   : > { %v1133_v25 = vpop.f32.mrb[9].mxu1 }
 0x3a0   : > { %v774_v26 = vpop.f32.mrb[10].mxu1 }
 0x3a1   : > { %v1134_v27 = vpop.f32.mrb[11].mxu1 }
 0x3ae   : > { %v836_v28 = vpop.f32.mrb[12].mxu1 }
 0x3af   : > { %1239 = vrcp.f32 %v836_v28  ;;  %v1145_v29 = vpop.f32.mrb[13].mxu1 }
 0x3b0   : > { %v839_v30 = vpop.f32.mrb[14].mxu1 }
 0x3b1   : > { %1241 = vrcp.f32 %v839_v30  ;;  %v1146_v31 = vpop.f32.mrb[15].mxu1 }
 0x3b9   : > { %v1240_v32 = vpop.eup %1239 }
 0x3ba   : > { %v845_v33 = vmul.f32 %v1240_v32, %v771_v24 }
 0x3bb   : > { %v1242_v0 = vpop.eup %1241 }
 0x3bc   : > { %v846_v34 = vmul.f32 %v1242_v0, %v774_v26 }
 0x3be   : > { %v847_v35 = vpack.c.bf16 %v846_v34, %v845_v33 }
 0x3c0   : > { %1152 = vmatmul.mubr.msk.bf16.vlgmr.msra.gmra.mrb[8].mxu0 %vm464_vm2, %v847_v35 }
 0x493   : > { %v908_v37 = vpop.f32.mrb[8].mxu0 }
 0x494   : > { %v909_v38 = vadd.f32 %v1056_v36, %v908_v37  ;;  %v1153_v39 = vpop.f32.mrb[9].mxu0 }
 0x495   : > { %v911_v40 = vpop.f32.mrb[10].mxu0 }
 0x496   : > { %915 = vst.msk [vmem:[%s423_s16] sm:$0xff] %vm464_vm2, %v909_v38  ;;  %v912_v41 = vadd.f32 %v1056_v36, %v911_v40  ;;  %v1154_v42 = vpop.f32.mrb[11].mxu0 }
 0x498   : > { %916 = vst.msk [vmem:[%s423_s16 + $0x8] sm:$0xff] %vm464_vm2, %v912_v41 }
 0x499   : > { %1312 = shalt.err (!%p1309_p13)
}
 0x49a   : > { %s1313_s23 = scalar_lea.hbm %s1674_s25, 256  ;;  %s1317_s13 = scalar_lea.hbm %s1730_s11, 512 }
 0x49b   : > { %p1314_p5 = scmp.ne.s32.totalorder %s1674_s25, %s1313_s23  ;;  %p1318_p9 = scmp.lt.u32.totalorder %s1674_s25, %s1730_s11 }
 0x49c   : > { %p1319_p10 = scmp.lt.u32.totalorder %s1317_s13, %s1313_s23  ;;  %p1321_p1 = scmp.lt.u32.totalorder %s1313_s23, %s1674_s25 }
 0x49d   : > { %p1315_p0 = pnand %p1314_p5, %p1753_p2 }
 0x49e   : > { %p1320_p12 = por %p1319_p10, %p1318_p9 }
 0x49f   : > { %p1316_p6 = pneg %p1315_p0 }
 0x4a0   : > { %p1322_p3 = por %p1321_p1, %p1320_p12 }
 0x4a2   : > { %p1323_p4 = pnand %p1322_p3, %p1316_p6 }
 0x4a4   : > { %1326 = shalt.err (!%p1323_p4)
}
 0x4a5   : > { %s1378_s19 = smov 128   ;;  %s1379_s26 = smov 8  }
 0x4a6   : > { %1163 = dma.vmem_to_hbm [thread:$0]  (%p1753_p2), %s1669_s22, 256, %s1674_s25, %s1678_s21, %s1378_s19, %s1378_s19, %s1379_s26  }
 0x4a7 PF: > { %s1754_s24 = sld [smem:[#allocation11_spill]]  ;;  %s1755_s30 = sld [smem:[#allocation15_spill]] }
 0x4a8   : > { %p1180_p7 = scmp.ge.s32.totalorder %s1369_s20, 2 }
 0x4ad   : > { %s946_s14 = sand.u32 1, %s1754_s24   ;;  %p1756_p8 = scmp.ne.s32.totalorder %s1755_s30, 0 }
 0x4ae   : > { %s947_s12 = scalar_lea.sflag [#allocation4], %s946_s14 }
 0x4af   : > { %p1173_p11 = pnand %p1180_p7, %p1756_p8 }
 0x4b1   : > { %1352 = dma.done.wait (!%p1173_p11), %s947_s12, 256  }
 0x4b2   : > { %1354 = vsyncadd (!%p1173_p11), %s947_s12, 4294967040  ;;  %s1757_s20 = sld [smem:[#allocation13_spill]]  ;;  %s1758_s23 = sld [smem:[#allocation12_spill]] }
 0x4b3   : > { %s1759_s19 = sld [smem:[#allocation14_spill]]  ;;  %s1760_s17 = smov %s1361_s18 }
 0x4b8   : > { %p23_p13 = scmp.ge.s32.totalorder %s1757_s20, 4   ;;  %s1761_s18 = smov %s1758_s23 }
 0x4ba   :  { %25 = sbr.rel (!%p23_p13) target bundleno = 5 (0x5), region = 111 }
 0x4c1   :  { %952 = vsyncpa [#allocation3], 1 }
 0x4c2   :  { %954 = vsyncpa [#allocation3 + $0x1], 1 }
 0x4c3   :  { %955 = vsyncpa [#allocation6], 1 }
 0x4c4   :  { %956 = vsyncpa [#allocation4], 1 }
 0x4c5   :  { %958 = vsyncpa [#allocation4 + $0x1], 1 }

</bundles_post_ra>
